<compile_context>
chip_gen: v6e
topology: v6e:2x2x1
jax: 0.10.0
libtpu: 0.0.40
codegen_flags: <defaults>
</compile_context>

<pallas_src>
import jax
import jax.numpy as jnp
from jax.experimental import pallas as pl
from jax.experimental.pallas import tpu as pltpu


# ----------------------------- Pallas kernels -------------------------------

def _matmul_bias_fullk_kernel(x_ref, w_ref, b_ref, o_ref):
    """Full-K single-step tile: one MXU pass, bias fused, no scratch."""
    o_ref[...] = (
        jnp.dot(x_ref[...], w_ref[...], preferred_element_type=jnp.float32)
        + b_ref[...]
    ).astype(o_ref.dtype)


def _matmul_bias_ktiled_kernel(x_ref, w_ref, b_ref, o_ref, acc_ref):
    """K-tiled tile: f32 VMEM accumulator, init/finalize via pl.when."""
    k = pl.program_id(2)

    @pl.when(k == 0)
    def _init():
        acc_ref[...] = jnp.zeros_like(acc_ref)

    acc_ref[...] += jnp.dot(x_ref[...], w_ref[...],
                            preferred_element_type=jnp.float32)

    @pl.when(k == pl.num_programs(2) - 1)
    def _finalize():
        o_ref[...] = (acc_ref[...] + b_ref[...]).astype(o_ref.dtype)


# ------------------------------ Wrappers -------------------------------------

def _round_up(x, m):
    return ((x + m - 1) // m) * m


def _divisor_tile(dim, max_tile, unit=128):
    """Largest multiple of `unit` <= max_tile that divides round_up(dim, unit)."""
    p = _round_up(dim, unit)
    t = min((max_tile // unit) * unit, p)
    while t > unit and p % t != 0:
        t -= unit
    return t, p


_FULLK_MAX = 2048   # single-step reduction whenever K fits (typical ESM dims)
_TM_MAX = 512
_TN_MAX = 512
# Working set bound (double-buffered bf16 inputs + out tiles + f32 acc) with
# the caps above is <= ~10.5 MiB -> under the default scoped VMEM on
# v5e (16 MiB) and v6e/v7x (32 MiB).


def _matmul_bias(x, w, b, *, out_dtype=jnp.float32):
    """y = x @ w + b as a tiled Pallas MXU matmul with f32 accumulation.

    x: (M, K)  bf16 (or f32)
    w: (K, N)  bf16 (or f32)
    b: (1, N)  f32
    returns (M, N) in out_dtype.
    """
    M, K = x.shape
    Kw, N = w.shape
    assert K == Kw and b.shape == (1, N)

    # --- M tile: bf16 packs two rows per sublane -> multiple of 16 (never 8).
    if M <= _TM_MAX:
        tm = max(16, _round_up(M, 16))
        Mp = tm
    else:
        tm = _TM_MAX
        Mp = _round_up(M, tm)

    # --- N tile: full extent if small, else a 128-multiple dividing padded N.
    if N <= _TN_MAX:
        tn = N
        Np = N
    else:
        tn, Np = _divisor_tile(N, _TN_MAX)

    # --- K: full-extent single-step reduction whenever it fits in the budget.
    full_k = K <= _FULLK_MAX
    if full_k:
        tk, Kp = K, K
    else:
        tk, Kp = _divisor_tile(K, _FULLK_MAX)

    # --- Megacore (v7x has 2 TCs): ensure a parallel axis has >= 2 blocks
    #     whenever the split stays (16,128)/(8,128)-legal.
    if Mp // tm == 1 and Np // tn == 1:
        if tn % 256 == 0:
            tn //= 2
        elif tm % 32 == 0:
            tm //= 2

    # --- zero-pad to the tile grid (rare with divisor-friendly tiles; exact
    #     for matmul; padded rows/cols sliced off below).
    xp = x if (Mp == M and Kp == K) else jnp.pad(x, ((0, Mp - M), (0, Kp - K)))
    wp = w if (Kp == K and Np == N) else jnp.pad(w, ((0, Kp - K), (0, Np - N)))
    bp = b if Np == N else jnp.pad(b, ((0, 0), (0, Np - N)))

    if full_k:
        out = pl.pallas_call(
            _matmul_bias_fullk_kernel,
            out_shape=jax.ShapeDtypeStruct((Mp, Np), out_dtype),
            grid=(Mp // tm, Np // tn),
            in_specs=[
                pl.BlockSpec((tm, Kp), lambda i, j: (i, 0)),   # activations
                pl.BlockSpec((Kp, tn), lambda i, j: (0, j)),   # weight tile
                pl.BlockSpec((1, tn), lambda i, j: (0, j)),    # bias tile
            ],
            out_specs=pl.BlockSpec((tm, tn), lambda i, j: (i, j)),
            compiler_params=pltpu.CompilerParams(
                dimension_semantics=("parallel", "parallel")),
        )(xp, wp, bp)
    else:
        out = pl.pallas_call(
            _matmul_bias_ktiled_kernel,
            out_shape=jax.ShapeDtypeStruct((Mp, Np), out_dtype),
            grid=(Mp // tm, Np // tn, Kp // tk),
            in_specs=[
                pl.BlockSpec((tm, tk), lambda i, j, k: (i, k)),
                pl.BlockSpec((tk, tn), lambda i, j, k: (k, j)),
                pl.BlockSpec((1, tn), lambda i, j, k: (0, j)),
            ],
            out_specs=pl.BlockSpec((tm, tn), lambda i, j, k: (i, j)),
            scratch_shapes=[pltpu.VMEM((tm, tn), jnp.float32)],
            compiler_params=pltpu.CompilerParams(
                dimension_semantics=("parallel", "parallel", "arbitrary")),
        )(xp, wp, bp)

    if Mp != M or Np != N:
        out = out[:M, :N]
    return out


def make_esm_params(embed_table, W, b):
    """One-time parameter prep (bf16 casts hoisted out of the forward path)."""
    return dict(
        embed_bf16=embed_table.astype(jnp.bfloat16),   # halves gather traffic
        w_bf16=W.astype(jnp.bfloat16),                 # bf16 MXU operand
        b_f32=b.astype(jnp.float32).reshape(1, -1),    # bias stays f32
    )


def esm_encoder_forward(tokens, params, output="sequence",
                        token_dtype=jnp.bfloat16):
    """Synthetic ESMEncoder.forward.

    tokens: (B, L) int32
    params: from make_esm_params
    """
    assert output in ("sequence", "tokens")
    emb, w, b = params["embed_bf16"], params["w_bf16"], params["b_f32"]

    # client.encode(...): token -> embedding lookup (gather stays in XLA).
    x = jnp.take(emb, tokens, axis=0)                  # (B, L, D_in) bf16
    B, L, D_in = x.shape
    D_out = w.shape[1]

    if output == "tokens":
        y = _matmul_bias(x.reshape(B * L, D_in), w, b, out_dtype=token_dtype)
        return y.reshape(B, L, D_out)

    # 'sequence': linearity -> mean_L(x @ W + b) == mean_L(x) @ W + b.
    # L-reduction in f32 for accuracy; bf16 operand for the GEMM (MXU-native).
    x_mean = x.astype(jnp.float32).mean(axis=1).astype(jnp.bfloat16)  # (B, D_in)
    if B < 64:
        # A <64-row GEMM cannot fill the MXU and is dominated by launch /
        # per-step overhead; leave it to XLA (Pallas kept for the tokens path).
        return jnp.dot(x_mean, w, preferred_element_type=jnp.float32) + b
    return _matmul_bias(x_mean, w, b, out_dtype=jnp.float32)


# ------------------------------- Main -----------------------------------------

def _reference(tokens, embed_table, W, b):
    """Pure-JAX reference of the same synthesized client (bf16 params, f32 math)."""
    x = jnp.take(embed_table.astype(jnp.bfloat16).astype(jnp.float32),
                 tokens, axis=0)
    w32 = W.astype(jnp.bfloat16).astype(jnp.float32)
    ref_tok = jnp.einsum("bld,de->ble", x, w32) + b.astype(jnp.float32)
    ref_seq = ref_tok.mean(axis=1)
    return ref_tok, ref_seq


def _run_case(key, B, L, V, D_in, D_out, atol, rtol):
    k_tok, k_emb, k_w, k_b = jax.random.split(key, 4)
    tokens = jax.random.randint(k_tok, (B, L), 0, V, dtype=jnp.int32)
    embed_table = jax.random.normal(k_emb, (V, D_in), dtype=jnp.float32) * 0.1
    W = jax.random.normal(k_w, (D_in, D_out), dtype=jnp.float32) * 0.1
    b = jax.random.normal(k_b, (D_out,), dtype=jnp.float32) * 0.1

    params = make_esm_params(embed_table, W, b)

    out_seq = jax.block_until_ready(
        esm_encoder_forward(tokens, params, output="sequence"))
    out_tok = jax.block_until_ready(
        esm_encoder_forward(tokens, params, output="tokens"))

    ref_tok, ref_seq = _reference(tokens, embed_table, W, b)

    assert out_tok.shape == (B, L, D_out)
    assert out_seq.shape == (B, D_out)
    assert jnp.allclose(out_tok.astype(jnp.float32), ref_tok,
                        atol=atol, rtol=rtol), "tokens mismatch"
    assert jnp.allclose(out_seq.astype(jnp.float32), ref_seq,
                        atol=atol, rtol=rtol), "sequence mismatch"


if __name__ == "__main__":
    key = jax.random.PRNGKey(0)
    k1, k2, k3 = jax.random.split(key, 3)

    # Small shapes consistent with the module: batch=2, seq=8, vocab=24,
    # hidden=32 -> embedding dim 64.  Full-K kernel, single-block grid.
    _run_case(k1, B=2, L=8, V=24, D_in=32, D_out=64, atol=2e-3, rtol=2e-2)

    # ESM-like dims: full-K (K=640, no padding) + N tiling with tn=256 (1280/256).
    _run_case(k2, B=2, L=16, V=33, D_in=640, D_out=1280, atol=3e-3, rtol=3e-2)

    # K > 2048 -> K-tiled path (tk=1280, 2 exact steps) + megacore tn split.
    _run_case(k3, B=8, L=32, V=33, D_in=2560, D_out=512, atol=6e-3, rtol=3e-2)

    print("KERNEL_OK")
</pallas_src>

<mosaic_0001>
module attributes {stable_mosaic.version = 11 : i64} {
  func.func @_matmul_bias_fullk_kernel(%arg0: i32, %arg1: i32, %arg2: memref<16x32xbf16, #tpu.memory_space<vmem>>, %arg3: memref<32x64xbf16, #tpu.memory_space<vmem>>, %arg4: memref<1x64xf32, #tpu.memory_space<vmem>>, %arg5: memref<16x64xbf16, #tpu.memory_space<vmem>>) attributes {dimension_semantics = [#tpu.dimension_semantics<parallel>, #tpu.dimension_semantics<parallel>], iteration_bounds = array<i64: 1, 1>, scalar_prefetch = 0 : i64, scratch_operands = 0 : i64, tpu.core_type = #tpu.core_type<tc>, window_params = [{transform_indices = @transform_0, window_bounds = array<i64: 16, 32>}, {transform_indices = @transform_1, window_bounds = array<i64: 32, 64>}, {transform_indices = @transform_2, window_bounds = array<i64: 1, 64>}, {transform_indices = @transform_3, window_bounds = array<i64: 16, 64>}]} {
    %c0 = arith.constant 0 : index
    %c0_0 = arith.constant 0 : index
    %0 = vector.load %arg2[%c0, %c0_0] : memref<16x32xbf16, #tpu.memory_space<vmem>>, vector<16x32xbf16>
    %c0_1 = arith.constant 0 : index
    %c0_2 = arith.constant 0 : index
    %1 = vector.load %arg3[%c0_1, %c0_2] : memref<32x64xbf16, #tpu.memory_space<vmem>>, vector<32x64xbf16>
    %cst = arith.constant dense<0.000000e+00> : vector<16x64xf32>
    %2 = tpu.matmul %0, %1, %cst {dimension_numbers = #tpu.dot_dimension_numbers<[1], [0], [0], [1], [0, 0, 1, 1], [], []>} : vector<16x32xbf16>, vector<32x64xbf16>, vector<16x64xf32> -> vector<16x64xf32>
    %c0_3 = arith.constant 0 : index
    %c0_4 = arith.constant 0 : index
    %3 = vector.load %arg4[%c0_3, %c0_4] : memref<1x64xf32, #tpu.memory_space<vmem>>, vector<1x64xf32>
    %4 = vector.broadcast %3 : vector<1x64xf32> to vector<16x64xf32>
    %5 = arith.addf %2, %4 : vector<16x64xf32>
    %6 = arith.truncf %5 : vector<16x64xf32> to vector<16x64xbf16>
    %c0_5 = arith.constant 0 : index
    %c0_6 = arith.constant 0 : index
    %7 = vector.load %arg5[%c0_5, %c0_6] : memref<16x64xbf16, #tpu.memory_space<vmem>>, vector<16x64xbf16>
    tpu.vector_store %arg5[%c0_5, %c0_6], %6 {strides = array<i32>} : memref<16x64xbf16, #tpu.memory_space<vmem>>, vector<16x64xbf16>,
    return
  }
  func.func @transform_0(%arg0: i32, %arg1: i32) -> (i32, i32) {
    %c0_i32 = arith.constant 0 : i32
    %c0_i32_0 = arith.constant 0 : i32
    return %arg0, %c0_i32 : i32, i32
  }
  func.func @transform_1(%arg0: i32, %arg1: i32) -> (i32, i32) {
    %c0_i32 = arith.constant 0 : i32
    %c0_i32_0 = arith.constant 0 : i32
    return %c0_i32, %arg1 : i32, i32
  }
  func.func @transform_2(%arg0: i32, %arg1: i32) -> (i32, i32) {
    %c0_i32 = arith.constant 0 : i32
    %c0_i32_0 = arith.constant 0 : i32
    return %c0_i32, %arg1 : i32, i32
  }
  func.func @transform_3(%arg0: i32, %arg1: i32) -> (i32, i32) {
    %c0_i32 = arith.constant 0 : i32
    return %arg0, %arg1 : i32, i32
  }
}

</mosaic_0001>

<bundles_post_ra>
// kernel: tpu_custom_call.1
= control target key start
LH: loop header
LB: loop body
LE: loop exit
PB: predicated region body
PF: predicated region fallthrough
CT: control target
= control target key end

     0   :  { %8 = vsyncpa [#allocation3], 0  ;;  %s292_s0 = inlined_call_operand.hbm [shape: bf16[16,32], index: 0, kind: input, shape index: {}]   ;;  %s293_s1 = inlined_call_operand.hbm [shape: bf16[32,64], index: 1, kind: input, shape index: {}]   ;;  %s294_s2 = inlined_call_operand.vmem [shape: f32[1,64], index: 2, kind: input, shape index: {}]   ;;  %s295_s3 = inlined_call_operand.hbm [shape: bf16[16,64], index: 3, kind: output, shape index: {}]  }
   0x1   :  { %9 = vsyncpa [#allocation6], 0 }
   0x2   :  { %10 = vsyncpa [#allocation4], 0  ;;  %s244_s12 = smov [#allocation2]  }
   0x3   :  { %s16_s13 = sshll.u32 %s244_s12, 4  ;;  %s17_s13 = int_to_ptr.vmem [resolvable:$true] %s16_s13 }
   0x4   :  { %s186_s14 = scalar_lea.vmem %s17_s13, 128  ;;  %p191_p1 = scmp.lt.s32.totalorder %s17_s13, %s17_s13 }
   0x5   :  { %p187_p0 = scmp.ne.s32.totalorder %s17_s13, %s186_s14  ;;  %p192_p2 = scmp.lt.s32.totalorder %s186_s14, %s186_s14 }
   0x7   :  { %p193_p3 = por %p192_p2, %p191_p1 }
   0x9   :  { %p194_p4 = pnand %p193_p3, %p187_p0 }
   0xb   :  { %197 = shalt.err (!%p194_p4)
}
   0xc   :  { %s245_s15 = smov 64   ;;  %s246_s16 = smov 4  }
   0xd   :  { %22 = dma.hbm_to_vmem [thread:$0]  %s292_s0, 128, %s17_s13, [#allocation3], %s245_s15, %s245_s15, %s246_s16  }
   0xe   :  { %s247_s19 = smov [#allocation5]  }
   0xf   :  { %s28_s20 = sshll.u32 %s247_s19, 4  ;;  %s29_s20 = int_to_ptr.vmem [resolvable:$true] %s28_s20 }
  0x10   :  { %s206_s21 = scalar_lea.vmem %s29_s20, 256  ;;  %p211_p6 = scmp.lt.s32.totalorder %s29_s20, %s29_s20 }
  0x11   :  { %p207_p5 = scmp.ne.s32.totalorder %s29_s20, %s206_s21  ;;  %p212_p7 = scmp.lt.s32.totalorder %s206_s21, %s206_s21 }
  0x13   :  { %p213_p8 = por %p212_p7, %p211_p6 }
  0x15   :  { %p214_p9 = pnand %p213_p8, %p207_p5 }
  0x17   :  { %217 = shalt.err (!%p214_p9)
}
  0x18   :  { %34 = dma.hbm_to_vmem [thread:$0]  %s293_s1, 256, %s29_s20, [#allocation6], %s245_s15, %s245_s15, %s246_s16  }
  0x19   :  { %238 = dma.done.wait [#allocation3], 128  }
  0x1a   :  { %239 = vsyncadd [#allocation3], 4294967168 }
  0x1b   :  { %240 = dma.done.wait [#allocation6], 256  }
  0x1c   :  { %241 = vsyncadd [#allocation6], 4294967040  ;;  %v248_v0 = vmov 0.0   ;;  %vm249_vm0 = vmmov 0   ;;  %v175_v1 = vld [vmem:[#allocation5 + $0x8] sm:$0xff]   ;;  %v176_v2 = vld [vmem:[#allocation5] sm:$0xff]  }
  0x1d   :  { %160 = vmatprep.subr.bf16.mxu0 %v248_v0  ;;  %164 = vmatprep.mubr.msk.bf16.mxu0 %vm249_vm0, %v248_v0  ;;  %v177_v3 = vld [vmem:[#allocation2] sm:$0xff]   ;;  %vm74_vm1 = vcmask 261120   ;;  %vm127_vm2 = vcmask 519168   ;;  %s250_s1 = smov [#allocation7]  }
  0x1e   :  { %161 = vmatpush3.bf16.msra.mxu0 %v175_v1  ;;  %v148_v4 = vld [vmem:[%s294_s2] ss:$0 sm:$0xff]  ;;  %s135_s25 = sshll.u32 %s250_s1, 4  ;;  %s136_s25 = int_to_ptr.vmem [resolvable:$true] %s135_s25 }
  0x1f   :  { %162 = vmatprep.subr.bf16.mxu0 %v248_v0  ;;  %s218_s26 = scalar_lea.vmem %s136_s25, 128  ;;  %p223_p11 = scmp.lt.s32.totalorder %s136_s25, %s136_s25 }
  0x20   :  { %p219_p10 = scmp.ne.s32.totalorder %s136_s25, %s218_s26  ;;  %p224_p12 = scmp.lt.s32.totalorder %s218_s26, %s218_s26 }
  0x22   :  { %163 = vmatpush3.bf16.msra.mxu0 %v176_v2  ;;  %p225_p13 = por %p224_p12, %p223_p11 }
  0x24   :  { %p226_p0 = pnand %p225_p13, %p219_p10 }
  0x25   :  { %165 = vmatmul.mubr.msk.bf16.vlgmr.msra.gmra.mxu0 %vm74_vm1, %v177_v3 }
  0xe5   :  { %v112_v5 = vpop.f32.mrf.mxu0 }
  0xe6   :  { %v113_v6 = vadd.f32 %v148_v4, %v112_v5 }
  0xe7   :  { %v166_v7 = vpop.f32.mrf.mxu0 }
  0xe8   :  { %v155_v8 = vpack.c.bf16 %v113_v6, %v113_v6 }
  0xe9   :  { %v115_v9 = vpop.f32.mrf.mxu0 }
  0xea   :  { %v116_v10 = vadd.f32 %v148_v4, %v115_v9  ;;  %128 = vst.msk [vmem:[#allocation7] sm:$0xf] %vm127_vm2, %v155_v8 }
  0xeb   :  { %v167_v11 = vpop.f32.mrf.mxu0 }
  0xec   :  { %v156_v12 = vpack.c.bf16 %v116_v10, %v116_v10 }
  0xee   :  { %129 = vst.msk [vmem:[#allocation7 + $0x4] sm:$0xf] %vm127_vm2, %v156_v12 }
  0xef   :  { %229 = shalt.err (!%p226_p0)
}
  0xf0   :  { %141 = dma.vmem_to_hbm [thread:$0]  %s136_s25, 128, %s295_s3, [#allocation4], %s245_s15, %s245_s15, %s246_s16  }
  0xf1   :  { %242 = dma.done.wait [#allocation4], 128  }
  0xf2   :  { %243 = vsyncadd [#allocation4], 4294967168 }
  0xf3   :  { %145 = vsyncpa [#allocation3], 1 }
  0xf4   :  { %146 = vsyncpa [#allocation6], 1 }
  0xf5   :  { %147 = vsyncpa [#allocation4], 1 }

</bundles_post_ra>
